<compile_context>
chip_gen: v7x
topology: tpu7x:2x2x1
jax: 0.10.0
libtpu: 0.0.40
codegen_flags: <defaults>
</compile_context>

<pallas_src>
import jax
import jax.numpy as jnp
from jax.experimental import pallas as pl
from jax.experimental.pallas import tpu as pltpu

HIDDEN_DIM = 128
HEADS = 4
DIM_HEAD = 16
INNER = HEADS * DIM_HEAD           # 64
SCALE = DIM_HEAD ** -0.5           # 0.25 (exact power of two -> safe to fold into bf16 weights)


def _invariant_kernel(x_ref, wqkv_ref, wo_ref, bo_ref, out_ref):
    # x_ref:    (TB, N, D)   bf16  TB batch elements per grid step
    # wqkv_ref: (D, 3*INNER) bf16  pre-transposed; q columns pre-scaled by dh**-0.5
    # wo_ref:   (INNER, D)   bf16  pre-transposed to_out weight
    # bo_ref:   (1, D)       f32   to_out bias
    # out_ref:  (TB, D)      f32   sequence-mean pooled output rows
    TB, N, D = x_ref.shape

    # One big qkv projection on the flattened (TB*N, D) row slab (bf16 in, f32 out).
    # Note: the reshape is a free view when N is a multiple of the sublane count.
    x = x_ref[...].reshape(TB * N, D)
    qkv = jnp.dot(x, wqkv_ref[...],
                  preferred_element_type=jnp.float32)          # (TB*N, 3*INNER) f32
    qkv = qkv.reshape(TB, N, 3 * INNER)

    head_pools = []
    for h in range(HEADS):                                     # static unroll over heads
        q_h = qkv[:, :, h * DIM_HEAD:(h + 1) * DIM_HEAD]                        # (TB, N, dh)
        k_h = qkv[:, :, INNER + h * DIM_HEAD:INNER + (h + 1) * DIM_HEAD]        # (TB, N, dh)
        v_h = qkv[:, :, 2 * INNER + h * DIM_HEAD:2 * INNER + (h + 1) * DIM_HEAD]

        # softmax scale already folded into the q columns of wqkv; all f32.
        dots = jnp.einsum('bnd,bmd->bnm', q_h, k_h,
                          preferred_element_type=jnp.float32)                   # (TB, N, N)
        dots = dots - jnp.max(dots, axis=-1, keepdims=True)
        p = jnp.exp(dots)
        attn = p * pl.reciprocal(jnp.sum(p, axis=-1, keepdims=True), approx=False)

        # Pool over query rows BEFORE the value contraction (exact by linearity),
        # then do the tiny (N -> dh) contraction on the VPU instead of TB M=1 matmuls.
        attn_pool = jnp.mean(attn, axis=1)                                      # (TB, N)
        head_pools.append(jnp.sum(attn_pool[:, :, None] * v_h, axis=1))         # (TB, dh)

    # Lane-concat the pooled heads and run ONE K=64 output projection on the MXU.
    pooled = jnp.concatenate(head_pools, axis=-1)                               # (TB, INNER)
    out = jnp.dot(pooled.astype(wo_ref.dtype), wo_ref[...],
                  preferred_element_type=jnp.float32)                           # (TB, D)
    out_ref[...] = (out + bo_ref[...]).astype(out_ref.dtype)


def _pick_batch_tile(B, N, target_rows=2048):
    """Batch-tile size TB (TB*N rows per grid step).

    Constraints / preferences:
      * TB == B or TB % 8 == 0 keeps the (TB, D) output block layout-legal.
      * TB*N <= target_rows (measured: 1024+ rows already sits at ~86% of the
        HBM roofline, so ~2048 leaves per-step overhead negligible).
      * prefer >= 2 grid steps, and an even number of steps, so v7x's two
        TensorCores both get work via dimension_semantics=("parallel",).
    """
    cands = [d for d in range(1, B + 1)
             if B % d == 0 and d * N <= target_rows and (d % 8 == 0 or d == B)]
    if not cands:
        return B            # one full-batch block: always layout-legal

    def pref(d):
        steps = B // d
        return (steps >= 2, steps >= 2 and steps % 2 == 0, d)

    return max(cands, key=pref)


def prepare_invariant_params(w_qkv, w_out, b_out):
    """One-time parameter prep (outside the per-call path): transpose to the
    y = x @ W layout, fold the softmax scale into the q columns of w_qkv, and
    cast the matmul weights to bf16 (bias stays f32)."""
    col_scale = jnp.concatenate([
        jnp.full((INNER,), SCALE, dtype=jnp.float32),
        jnp.ones((2 * INNER,), dtype=jnp.float32),
    ])
    wqkv_t = (w_qkv.T.astype(jnp.float32) * col_scale[None, :]).astype(jnp.bfloat16)
    wo_t = w_out.T.astype(jnp.bfloat16)           # (INNER, D)
    bo = b_out.reshape(1, -1).astype(jnp.float32)  # (1, D)
    return wqkv_t, wo_t, bo


def invariant_forward(x, wqkv_t, wo_t, bo):
    """x: (B, N, D) float32; params from prepare_invariant_params.  Returns (B, D) f32."""
    B, N, D = x.shape
    assert D == HIDDEN_DIM
    TB = _pick_batch_tile(B, N)
    assert B % TB == 0

    # Stream x as bf16 (halves the HBM traffic that bounds v6e/v7x); all
    # accumulation inside the kernel is f32.
    x_bf16 = x.astype(jnp.bfloat16)

    return pl.pallas_call(
        _invariant_kernel,
        out_shape=jax.ShapeDtypeStruct((B, D), jnp.float32),
        grid_spec=pltpu.PrefetchScalarGridSpec(
            num_scalar_prefetch=0,
            grid=(B // TB,),
            in_specs=[
                pl.BlockSpec((TB, N, D), lambda b: (b, 0, 0)),
                pl.BlockSpec((D, 3 * INNER), lambda b: (0, 0)),   # resident across steps
                pl.BlockSpec((INNER, D), lambda b: (0, 0)),
                pl.BlockSpec((1, D), lambda b: (0, 0)),
            ],
            out_specs=pl.BlockSpec((TB, D), lambda b: (b, 0)),
        ),
        compiler_params=pltpu.CompilerParams(
            dimension_semantics=("parallel",),
            # Covers double-buffered x tiles / intermediates with headroom while
            # staying inside v7x's 64 MiB physical VMEM.
            vmem_limit_bytes=48 * 1024 * 1024,
        ),
    )(x_bf16, wqkv_t, wo_t, bo)


def invariant_reference(x, w_qkv, w_out, b_out):
    """Pure-JAX f32 reference mirroring the PyTorch module."""
    B, N, D = x.shape
    qkv = jnp.einsum("bnd,ed->bne", x, w_qkv)                # Linear: x @ W.T
    q, k, v = jnp.split(qkv, 3, axis=-1)

    def split_heads(t):                                      # (B,N,INNER) -> (B,H,N,dh)
        return t.reshape(B, N, HEADS, DIM_HEAD).transpose(0, 2, 1, 3)

    q, k, v = map(split_heads, (q, k, v))
    dots = jnp.einsum("bhnd,bhmd->bhnm", q, k) * SCALE
    attn = jax.nn.softmax(dots, axis=-1)
    out = jnp.einsum("bhnm,bhmd->bhnd", attn, v)
    out = out.transpose(0, 2, 1, 3).reshape(B, N, INNER)
    out = jnp.einsum("bne,de->bnd", out, w_out) + b_out      # to_out Linear
    return out.mean(axis=1)                                  # mean over dim=1


if __name__ == "__main__":
    B, N, D = 2, 8, HIDDEN_DIM

    key = jax.random.PRNGKey(0)
    kx, kq, ko, kb = jax.random.split(key, 4)

    x = jax.random.normal(kx, (B, N, D), dtype=jnp.float32)
    # PyTorch Linear layout: (out_features, in_features).
    w_qkv = jax.random.normal(kq, (3 * INNER, D), dtype=jnp.float32) * (1.0 / D ** 0.5)
    w_out = jax.random.normal(ko, (D, INNER), dtype=jnp.float32) * (1.0 / INNER ** 0.5)
    b_out = jax.random.normal(kb, (D,), dtype=jnp.float32) * 0.01

    params = prepare_invariant_params(w_qkv, w_out, b_out)
    y = invariant_forward(x, *params)
    jax.block_until_ready(y)

    y_ref = invariant_reference(x, w_qkv, w_out, b_out)
    assert y.shape == (B, D)
    # bf16 matmul inputs (x, Wqkv, Wo) introduce ~1e-2-level absolute error end-to-end;
    # softmax itself is exact f32.
    assert jnp.allclose(y, y_ref, rtol=3e-2, atol=3e-2), "mismatch vs reference"

    print("KERNEL_OK")
</pallas_src>

<mosaic_0001>
module attributes {stable_mosaic.version = 11 : i64} {
  func.func @_invariant_kernel(%arg0: i32, %arg1: memref<2x8x128xbf16, #tpu.memory_space<vmem>>, %arg2: memref<128x192xbf16, #tpu.memory_space<vmem>>, %arg3: memref<64x128xbf16, #tpu.memory_space<vmem>>, %arg4: memref<1x128xf32, #tpu.memory_space<vmem>>, %arg5: memref<2x128xf32, #tpu.memory_space<vmem>>) attributes {dimension_semantics = [#tpu.dimension_semantics<parallel>], iteration_bounds = array<i64: 1>, scalar_prefetch = 0 : i64, scratch_operands = 0 : i64, tpu.core_type = #tpu.core_type<tc>, window_params = [{transform_indices = @transform_0, window_bounds = array<i64: 2, 8, 128>}, {pipeline_mode = #tpu.pipeline_mode<synchronous>, transform_indices = @transform_1, window_bounds = array<i64: 128, 192>}, {pipeline_mode = #tpu.pipeline_mode<synchronous>, transform_indices = @transform_2, window_bounds = array<i64: 64, 128>}, {pipeline_mode = #tpu.pipeline_mode<synchronous>, transform_indices = @transform_3, window_bounds = array<i64: 1, 128>}, {transform_indices = @transform_4, window_bounds = array<i64: 2, 128>}]} {
    %c0 = arith.constant 0 : index
    %c0_0 = arith.constant 0 : index
    %c0_1 = arith.constant 0 : index
    %0 = vector.load %arg1[%c0, %c0_0, %c0_1] : memref<2x8x128xbf16, #tpu.memory_space<vmem>>, vector<2x8x128xbf16>
    %1 = vector.shape_cast %0 : vector<2x8x128xbf16> to vector<16x128xbf16>
    %c0_2 = arith.constant 0 : index
    %c0_3 = arith.constant 0 : index
    %2 = vector.load %arg2[%c0_2, %c0_3] : memref<128x192xbf16, #tpu.memory_space<vmem>>, vector<128x192xbf16>
    %cst = arith.constant dense<0.000000e+00> : vector<16x192xf32>
    %3 = tpu.matmul %1, %2, %cst {dimension_numbers = #tpu.dot_dimension_numbers<[1], [0], [0], [1], [0, 0, 1, 1], [], []>} : vector<16x128xbf16>, vector<128x192xbf16>, vector<16x192xf32> -> vector<16x192xf32>
    %4 = vector.shape_cast %3 : vector<16x192xf32> to vector<2x8x192xf32>
    %5 = vector.extract_strided_slice %4 {offsets = [0, 0, 0], sizes = [2, 8, 16], strides = [1, 1, 1]} : vector<2x8x192xf32> to vector<2x8x16xf32>
    %6 = vector.extract_strided_slice %4 {offsets = [0, 0, 64], sizes = [2, 8, 16], strides = [1, 1, 1]} : vector<2x8x192xf32> to vector<2x8x16xf32>
    %7 = vector.extract_strided_slice %4 {offsets = [0, 0, 128], sizes = [2, 8, 16], strides = [1, 1, 1]} : vector<2x8x192xf32> to vector<2x8x16xf32>
    "tpu.trace_start"() <{level = 10 : i32, message = "bnd,bmd->bnm"}> : () -> ()
    %cst_4 = arith.constant dense<0.000000e+00> : vector<2x8x8xf32>
    %8 = tpu.matmul %5, %6, %cst_4 {dimension_numbers = #tpu.dot_dimension_numbers<[2], [2], [1], [1], [0, 0, 0, 1, 1, 1], [0], [0]>} : vector<2x8x16xf32>, vector<2x8x16xf32>, vector<2x8x8xf32> -> vector<2x8x8xf32>
    "tpu.trace_stop"() : () -> ()
    %cst_5 = arith.constant dense<0xFF800000> : vector<2x8xf32>
    %9 = vector.multi_reduction <maximumf>, %8, %cst_5 [2] : vector<2x8x8xf32> to vector<2x8xf32>
    %10 = vector.shape_cast %9 : vector<2x8xf32> to vector<2x8x1xf32>
    %11 = vector.broadcast %10 : vector<2x8x1xf32> to vector<2x8x8xf32>
    %12 = arith.subf %8, %11 : vector<2x8x8xf32>
    %13 = math.exp %12 : vector<2x8x8xf32>
    %cst_6 = arith.constant dense<0.000000e+00> : vector<2x8xf32>
    %14 = vector.multi_reduction <add>, %13, %cst_6 [2] : vector<2x8x8xf32> to vector<2x8xf32>
    %15 = vector.shape_cast %14 : vector<2x8xf32> to vector<2x8x1xf32>
    %16 = tpu.reciprocal %15 : vector<2x8x1xf32> -> vector<2x8x1xf32>
    %17 = vector.broadcast %16 : vector<2x8x1xf32> to vector<2x8x8xf32>
    %18 = arith.mulf %13, %17 : vector<2x8x8xf32>
    %cst_7 = arith.constant dense<0.000000e+00> : vector<2x8xf32>
    %19 = vector.multi_reduction <add>, %18, %cst_7 [1] : vector<2x8x8xf32> to vector<2x8xf32>
    %cst_8 = arith.constant 8.000000e+00 : f32
    %20 = vector.broadcast %cst_8 : f32 to vector<2x8xf32>
    %21 = arith.divf %19, %20 : vector<2x8xf32>
    %22 = vector.shape_cast %21 : vector<2x8xf32> to vector<2x8x1xf32>
    %23 = vector.broadcast %22 : vector<2x8x1xf32> to vector<2x8x16xf32>
    %24 = arith.mulf %23, %7 : vector<2x8x16xf32>
    %cst_9 = arith.constant dense<0.000000e+00> : vector<2x16xf32>
    %25 = vector.multi_reduction <add>, %24, %cst_9 [1] : vector<2x8x16xf32> to vector<2x16xf32>
    %26 = vector.extract_strided_slice %4 {offsets = [0, 0, 16], sizes = [2, 8, 16], strides = [1, 1, 1]} : vector<2x8x192xf32> to vector<2x8x16xf32>
    %27 = vector.extract_strided_slice %4 {offsets = [0, 0, 80], sizes = [2, 8, 16], strides = [1, 1, 1]} : vector<2x8x192xf32> to vector<2x8x16xf32>
    %28 = vector.extract_strided_slice %4 {offsets = [0, 0, 144], sizes = [2, 8, 16], strides = [1, 1, 1]} : vector<2x8x192xf32> to vector<2x8x16xf32>
    "tpu.trace_start"() <{level = 10 : i32, message = "bnd,bmd->bnm"}> : () -> ()
    %cst_10 = arith.constant dense<0.000000e+00> : vector<2x8x8xf32>
    %29 = tpu.matmul %26, %27, %cst_10 {dimension_numbers = #tpu.dot_dimension_numbers<[2], [2], [1], [1], [0, 0, 0, 1, 1, 1], [0], [0]>} : vector<2x8x16xf32>, vector<2x8x16xf32>, vector<2x8x8xf32> -> vector<2x8x8xf32>
    "tpu.trace_stop"() : () -> ()
    %cst_11 = arith.constant dense<0xFF800000> : vector<2x8xf32>
    %30 = vector.multi_reduction <maximumf>, %29, %cst_11 [2] : vector<2x8x8xf32> to vector<2x8xf32>
    %31 = vector.shape_cast %30 : vector<2x8xf32> to vector<2x8x1xf32>
    %32 = vector.broadcast %31 : vector<2x8x1xf32> to vector<2x8x8xf32>
    %33 = arith.subf %29, %32 : vector<2x8x8xf32>
    %34 = math.exp %33 : vector<2x8x8xf32>
    %cst_12 = arith.constant dense<0.000000e+00> : vector<2x8xf32>
    %35 = vector.multi_reduction <add>, %34, %cst_12 [2] : vector<2x8x8xf32> to vector<2x8xf32>
    %36 = vector.shape_cast %35 : vector<2x8xf32> to vector<2x8x1xf32>
    %37 = tpu.reciprocal %36 : vector<2x8x1xf32> -> vector<2x8x1xf32>
    %38 = vector.broadcast %37 : vector<2x8x1xf32> to vector<2x8x8xf32>
    %39 = arith.mulf %34, %38 : vector<2x8x8xf32>
    %cst_13 = arith.constant dense<0.000000e+00> : vector<2x8xf32>
    %40 = vector.multi_reduction <add>, %39, %cst_13 [1] : vector<2x8x8xf32> to vector<2x8xf32>
    %cst_14 = arith.constant 8.000000e+00 : f32
    %41 = vector.broadcast %cst_14 : f32 to vector<2x8xf32>
    %42 = arith.divf %40, %41 : vector<2x8xf32>
    %43 = vector.shape_cast %42 : vector<2x8xf32> to vector<2x8x1xf32>
    %44 = vector.broadcast %43 : vector<2x8x1xf32> to vector<2x8x16xf32>
    %45 = arith.mulf %44, %28 : vector<2x8x16xf32>
    %cst_15 = arith.constant dense<0.000000e+00> : vector<2x16xf32>
    %46 = vector.multi_reduction <add>, %45, %cst_15 [1] : vector<2x8x16xf32> to vector<2x16xf32>
    %47 = vector.extract_strided_slice %4 {offsets = [0, 0, 32], sizes = [2, 8, 16], strides = [1, 1, 1]} : vector<2x8x192xf32> to vector<2x8x16xf32>
    %48 = vector.extract_strided_slice %4 {offsets = [0, 0, 96], sizes = [2, 8, 16], strides = [1, 1, 1]} : vector<2x8x192xf32> to vector<2x8x16xf32>
    %49 = vector.extract_strided_slice %4 {offsets = [0, 0, 160], sizes = [2, 8, 16], strides = [1, 1, 1]} : vector<2x8x192xf32> to vector<2x8x16xf32>
    "tpu.trace_start"() <{level = 10 : i32, message = "bnd,bmd->bnm"}> : () -> ()
    %cst_16 = arith.constant dense<0.000000e+00> : vector<2x8x8xf32>
    %50 = tpu.matmul %47, %48, %cst_16 {dimension_numbers = #tpu.dot_dimension_numbers<[2], [2], [1], [1], [0, 0, 0, 1, 1, 1], [0], [0]>} : vector<2x8x16xf32>, vector<2x8x16xf32>, vector<2x8x8xf32> -> vector<2x8x8xf32>
    "tpu.trace_stop"() : () -> ()
    %cst_17 = arith.constant dense<0xFF800000> : vector<2x8xf32>
    %51 = vector.multi_reduction <maximumf>, %50, %cst_17 [2] : vector<2x8x8xf32> to vector<2x8xf32>
    %52 = vector.shape_cast %51 : vector<2x8xf32> to vector<2x8x1xf32>
    %53 = vector.broadcast %52 : vector<2x8x1xf32> to vector<2x8x8xf32>
    %54 = arith.subf %50, %53 : vector<2x8x8xf32>
    %55 = math.exp %54 : vector<2x8x8xf32>
    %cst_18 = arith.constant dense<0.000000e+00> : vector<2x8xf32>
    %56 = vector.multi_reduction <add>, %55, %cst_18 [2] : vector<2x8x8xf32> to vector<2x8xf32>
    %57 = vector.shape_cast %56 : vector<2x8xf32> to vector<2x8x1xf32>
    %58 = tpu.reciprocal %57 : vector<2x8x1xf32> -> vector<2x8x1xf32>
    %59 = vector.broadcast %58 : vector<2x8x1xf32> to vector<2x8x8xf32>
    %60 = arith.mulf %55, %59 : vector<2x8x8xf32>
    %cst_19 = arith.constant dense<0.000000e+00> : vector<2x8xf32>
    %61 = vector.multi_reduction <add>, %60, %cst_19 [1] : vector<2x8x8xf32> to vector<2x8xf32>
    %cst_20 = arith.constant 8.000000e+00 : f32
    %62 = vector.broadcast %cst_20 : f32 to vector<2x8xf32>
    %63 = arith.divf %61, %62 : vector<2x8xf32>
    %64 = vector.shape_cast %63 : vector<2x8xf32> to vector<2x8x1xf32>
    %65 = vector.broadcast %64 : vector<2x8x1xf32> to vector<2x8x16xf32>
    %66 = arith.mulf %65, %49 : vector<2x8x16xf32>
    %cst_21 = arith.constant dense<0.000000e+00> : vector<2x16xf32>
    %67 = vector.multi_reduction <add>, %66, %cst_21 [1] : vector<2x8x16xf32> to vector<2x16xf32>
    %68 = vector.extract_strided_slice %4 {offsets = [0, 0, 48], sizes = [2, 8, 16], strides = [1, 1, 1]} : vector<2x8x192xf32> to vector<2x8x16xf32>
    %69 = vector.extract_strided_slice %4 {offsets = [0, 0, 112], sizes = [2, 8, 16], strides = [1, 1, 1]} : vector<2x8x192xf32> to vector<2x8x16xf32>
    %70 = vector.extract_strided_slice %4 {offsets = [0, 0, 176], sizes = [2, 8, 16], strides = [1, 1, 1]} : vector<2x8x192xf32> to vector<2x8x16xf32>
    "tpu.trace_start"() <{level = 10 : i32, message = "bnd,bmd->bnm"}> : () -> ()
    %cst_22 = arith.constant dense<0.000000e+00> : vector<2x8x8xf32>
    %71 = tpu.matmul %68, %69, %cst_22 {dimension_numbers = #tpu.dot_dimension_numbers<[2], [2], [1], [1], [0, 0, 0, 1, 1, 1], [0], [0]>} : vector<2x8x16xf32>, vector<2x8x16xf32>, vector<2x8x8xf32> -> vector<2x8x8xf32>
    "tpu.trace_stop"() : () -> ()
    %cst_23 = arith.constant dense<0xFF800000> : vector<2x8xf32>
    %72 = vector.multi_reduction <maximumf>, %71, %cst_23 [2] : vector<2x8x8xf32> to vector<2x8xf32>
    %73 = vector.shape_cast %72 : vector<2x8xf32> to vector<2x8x1xf32>
    %74 = vector.broadcast %73 : vector<2x8x1xf32> to vector<2x8x8xf32>
    %75 = arith.subf %71, %74 : vector<2x8x8xf32>
    %76 = math.exp %75 : vector<2x8x8xf32>
    %cst_24 = arith.constant dense<0.000000e+00> : vector<2x8xf32>
    %77 = vector.multi_reduction <add>, %76, %cst_24 [2] : vector<2x8x8xf32> to vector<2x8xf32>
    %78 = vector.shape_cast %77 : vector<2x8xf32> to vector<2x8x1xf32>
    %79 = tpu.reciprocal %78 : vector<2x8x1xf32> -> vector<2x8x1xf32>
    %80 = vector.broadcast %79 : vector<2x8x1xf32> to vector<2x8x8xf32>
    %81 = arith.mulf %76, %80 : vector<2x8x8xf32>
    %cst_25 = arith.constant dense<0.000000e+00> : vector<2x8xf32>
    %82 = vector.multi_reduction <add>, %81, %cst_25 [1] : vector<2x8x8xf32> to vector<2x8xf32>
    %cst_26 = arith.constant 8.000000e+00 : f32
    %83 = vector.broadcast %cst_26 : f32 to vector<2x8xf32>
    %84 = arith.divf %82, %83 : vector<2x8xf32>
    %85 = vector.shape_cast %84 : vector<2x8xf32> to vector<2x8x1xf32>
    %86 = vector.broadcast %85 : vector<2x8x1xf32> to vector<2x8x16xf32>
    %87 = arith.mulf %86, %70 : vector<2x8x16xf32>
    %cst_27 = arith.constant dense<0.000000e+00> : vector<2x16xf32>
    %88 = vector.multi_reduction <add>, %87, %cst_27 [1] : vector<2x8x16xf32> to vector<2x16xf32>
    %89 = tpu.concatenate %25, %46, %67, %88 in 1 : vector<2x16xf32>, vector<2x16xf32>, vector<2x16xf32>, vector<2x16xf32> -> vector<2x64xf32>
    %90 = arith.truncf %89 : vector<2x64xf32> to vector<2x64xbf16>
    %c0_28 = arith.constant 0 : index
    %c0_29 = arith.constant 0 : index
    %91 = vector.load %arg3[%c0_28, %c0_29] : memref<64x128xbf16, #tpu.memory_space<vmem>>, vector<64x128xbf16>
    %cst_30 = arith.constant dense<0.000000e+00> : vector<2x128xf32>
    %92 = tpu.matmul %90, %91, %cst_30 {dimension_numbers = #tpu.dot_dimension_numbers<[1], [0], [0], [1], [0, 0, 1, 1], [], []>} : vector<2x64xbf16>, vector<64x128xbf16>, vector<2x128xf32> -> vector<2x128xf32>
    %c0_31 = arith.constant 0 : index
    %c0_32 = arith.constant 0 : index
    %93 = vector.load %arg4[%c0_31, %c0_32] : memref<1x128xf32, #tpu.memory_space<vmem>>, vector<1x128xf32>
    %94 = vector.broadcast %93 : vector<1x128xf32> to vector<2x128xf32>
    %95 = arith.addf %92, %94 : vector<2x128xf32>
    %c0_33 = arith.constant 0 : index
    %c0_34 = arith.constant 0 : index
    %96 = vector.load %arg5[%c0_33, %c0_34] : memref<2x128xf32, #tpu.memory_space<vmem>>, vector<2x128xf32>
    tpu.vector_store %arg5[%c0_33, %c0_34], %95 {strides = array<i32>} : memref<2x128xf32, #tpu.memory_space<vmem>>, vector<2x128xf32>,
    return
  }
  func.func @transform_0(%arg0: i32) -> (i32, i32, i32) {
    %c0_i32 = arith.constant 0 : i32
    %c0_i32_0 = arith.constant 0 : i32
    %c0_i32_1 = arith.constant 0 : i32
    return %arg0, %c0_i32, %c0_i32_0 : i32, i32, i32
  }
  func.func @transform_1(%arg0: i32) -> (i32, i32) {
    %c0_i32 = arith.constant 0 : i32
    %c0_i32_0 = arith.constant 0 : i32
    %c0_i32_1 = arith.constant 0 : i32
    return %c0_i32, %c0_i32_0 : i32, i32
  }
  func.func @transform_2(%arg0: i32) -> (i32, i32) {
    %c0_i32 = arith.constant 0 : i32
    %c0_i32_0 = arith.constant 0 : i32
    %c0_i32_1 = arith.constant 0 : i32
    return %c0_i32, %c0_i32_0 : i32, i32
  }
  func.func @transform_3(%arg0: i32) -> (i32, i32) {
    %c0_i32 = arith.constant 0 : i32
    %c0_i32_0 = arith.constant 0 : i32
    %c0_i32_1 = arith.constant 0 : i32
    return %c0_i32, %c0_i32_0 : i32, i32
  }
  func.func @transform_4(%arg0: i32) -> (i32, i32) {
    %c0_i32 = arith.constant 0 : i32
    %c0_i32_0 = arith.constant 0 : i32
    return %arg0, %c0_i32 : i32, i32
  }
}

</mosaic_0001>

<bundles_post_ra>
// kernel: tpu_custom_call.1
= control target key start
LH: loop header
LB: loop body
LE: loop exit
PB: predicated region body
PF: predicated region fallthrough
CT: control target
= control target key end

     0   :  { %v1363_v2 = vmov 0   ;;  %s1582_s0 = inlined_call_operand.vmem [shape: bf16[2,8,128], index: 0, kind: input, shape index: {}]   ;;  %s1583_s1 = inlined_call_operand.vmem [shape: bf16[128,192], index: 1, kind: input, shape index: {}]   ;;  %s1584_s2 = inlined_call_operand.vmem [shape: bf16[64,128], index: 2, kind: input, shape index: {}]   ;;  %s1585_s3 = inlined_call_operand.vmem [shape: f32[1,128], index: 3, kind: input, shape index: {}]   ;;  %s1586_s4 = inlined_call_operand.hbm [shape: f32[2,128], index: 4, kind: output, shape index: {}]  }
   0x1   :  { %v1278_v0 = vld [vmem:[%s1583_s1 + $0x4] ss:$8 sps:$4 sm:$0xff]   ;;  %v1280_v1 = vld [vmem:[%s1583_s1] ss:$8 sps:$4 sm:$0xff]   ;;  %155 = vmatprep.mubr.bf16.mxu0 %v1363_v2  ;;  %v1281_v3 = vld [vmem:[%s1583_s1 + $0x14] ss:$8 sps:$4 sm:$0xff]  }
   0x2   :  { %123 = vmatprep.subr.bf16.mxu0 %v1278_v0  ;;  %v1283_v4 = vld [vmem:[%s1583_s1 + $0x10] ss:$8 sps:$4 sm:$0xff]   ;;  %v1284_v5 = vld [vmem:[%s1583_s1 + $0x24] ss:$8 sps:$4 sm:$0xff]   ;;  %v1286_v6 = vld [vmem:[%s1583_s1 + $0x20] ss:$8 sps:$4 sm:$0xff]  }
   0x3   :  { %124 = vmatpush1.bf16.msra.mxu0 %v1280_v1  ;;  %v1287_v7 = vld [vmem:[%s1583_s1 + $0x34] ss:$8 sps:$4 sm:$0xff]   ;;  %v1289_v8 = vld [vmem:[%s1583_s1 + $0x30] ss:$8 sps:$4 sm:$0xff]   ;;  %v1290_v9 = vld [vmem:[%s1583_s1 + $0x44] ss:$8 sps:$4 sm:$0xff]  }
   0x4   :  { %125 = vmatprep.subr.bf16.mxu0 %v1281_v3 }
   0x7   :  { %126 = vmatpush1.bf16.msra.mxu0 %v1283_v4 }
   0x8   :  { %127 = vmatprep.subr.bf16.mxu0 %v1284_v5 }
   0xb   :  { %128 = vmatpush1.bf16.msra.mxu0 %v1286_v6 }
   0xc   :  { %129 = vmatprep.subr.bf16.mxu0 %v1287_v7 }
   0xd   :  { %9 = vsyncpa [#allocation3], 0  ;;  %v1292_v10 = vld [vmem:[%s1583_s1 + $0x40] ss:$8 sps:$4 sm:$0xff]   ;;  %v1293_v11 = vld [vmem:[%s1583_s1 + $0x54] ss:$8 sps:$4 sm:$0xff]  }
   0xe   :  { %v1295_v12 = vld [vmem:[%s1583_s1 + $0x50] ss:$8 sps:$4 sm:$0xff]   ;;  %v1296_v13 = vld [vmem:[%s1583_s1 + $0x64] ss:$8 sps:$4 sm:$0xff]   ;;  %v1298_v14 = vld [vmem:[%s1583_s1 + $0x60] ss:$8 sps:$4 sm:$0xff]  }
   0xf   :  { %130 = vmatpush1.bf16.msra.mxu0 %v1289_v8  ;;  %v1299_v15 = vld [vmem:[%s1583_s1 + $0x74] ss:$8 sps:$4 sm:$0xff]   ;;  %v1301_v16 = vld [vmem:[%s1583_s1 + $0x70] ss:$8 sps:$4 sm:$0xff]   ;;  %v1302_v17 = vld [vmem:[%s1582_s0] sm:$0xff]   ;;  %v1364_v18 = vmov 0.0  }
  0x10   :  { %131 = vmatprep.subr.bf16.mxu0 %v1290_v9  ;;  %1215 = vmatprep.subr.mxu1 %v1364_v18  ;;  %vm1365_vm0 = vmmov 0   ;;  %s1366_s1 = smov 48   ;;  %s1367_s23 = smov 64   ;;  %vm169_vm1 = vcmask 130048   ;;  %vm321_vm2 = vcmask 64512   ;;  %vm585_vm3 = vcmask 261248  }
  0x11   :  { %1217 = vmatprep.mubr.msk.f32.mxu1 %vm1365_vm0, %v1364_v18  ;;  %s1368_s0 = smov 112   ;;  %s1369_s24 = smov 96   ;;  %vm802_vm4 = vcmask 392448   ;;  %vm1036_vm5 = vcmask 1041409   ;;  %vm1019_vm6 = vcmask 523648   ;;  %vm1052_vm7 = vcmask 261120  }
  0x12   :  { %s1370_s25 = smov 32   ;;  %s1371_s26 = smov 80   ;;  %vm1054_vm8 = vcmask 392192   ;;  %vm1096_vm9 = vcmask 523264  }
  0x13   :  { %132 = vmatpush1.bf16.msra.mxu0 %v1292_v10  ;;  %s1372_s27 = smov 16   ;;  %s1373_s11 = smov [#allocation2]  }
  0x14   :  { %133 = vmatprep.subr.bf16.mxu0 %v1293_v11  ;;  %s1147_s12 = sshll.u32 %s1373_s11, 4  ;;  %s1148_s12 = int_to_ptr.vmem [resolvable:$true] %s1147_s12 }
  0x15   :  { %s1339_s13 = scalar_lea.vmem %s1148_s12, 32  ;;  %p1344_p1 = scmp.lt.s32.totalorder %s1148_s12, %s1148_s12 }
  0x16   :  { %p1340_p0 = scmp.ne.s32.totalorder %s1148_s12, %s1339_s13  ;;  %p1345_p2 = scmp.lt.s32.totalorder %s1339_s13, %s1339_s13 }
  0x17   :  { %134 = vmatpush1.bf16.msra.mxu0 %v1295_v12 }
  0x18   :  { %135 = vmatprep.subr.bf16.mxu0 %v1296_v13  ;;  %p1346_p3 = por %p1345_p2, %p1344_p1 }
  0x1a   :  { %p1347_p4 = pnand %p1346_p3, %p1340_p0 }
  0x1b   :  { %136 = vmatpush1.bf16.msra.mxu0 %v1298_v14 }
  0x1c   :  { %137 = vmatprep.subr.bf16.mxu0 %v1299_v15 }
  0x1f   :  { %138 = vmatpush1.bf16.msra.mxu0 %v1301_v16 }
  0x20   :  { %1255 = vmatprep.subr.bf16.mxu0 %v1364_v18 }
  0x22   :  { %156 = vmatmul.mubr.bf16.vlgmr.msra.gmra.mrb[0].mxu0 %v1302_v17 }
  0x23   :  { %1263 = vmatprep.mubr.msk.bf16.mxu0 %vm1365_vm0, %v1364_v18 }
  0xf5   :  { %v157_v19 = vpop.f32.mrb[0].mxu0 }
  0xf6   :  { %385 = vrot.lane.b32.xlu1 %v157_v19, %s1366_s1  ;;  %167 = vrot.lane.b32.xlu0 %v157_v19, %s1367_s23  ;;  %v1456_v20 = vpop.f32.mrb[1].mxu0 }
  0xf7   :  { %v161_v21 = vpop.f32.mrb[2].mxu0 }
  0xf8   :  { %v1458_v22 = vpop.f32.mrb[3].mxu0 }
  0xfa   :  { %383 = vrot.lane.b32.xlu1 %v157_v19, %s1368_s0  ;;  %245 = vrot.lane.b32.xlu0 %v161_v21, %s1367_s23 }
  0xfe   :  { %461 = vrot.lane.b32.xlu1 %v161_v21, %s1368_s0  ;;  %463 = vrot.lane.b32.xlu0 %v161_v21, %s1366_s1 }
 0x102   :  { %600 = vrot.lane.b32.xlu1 %v157_v19, %s1369_s24  ;;  %602 = vrot.lane.b32.xlu0 %v157_v19, %s1370_s25 }
 0x106   :  { %678 = vrot.lane.b32.xlu1 %v161_v21, %s1369_s24  ;;  %680 = vrot.lane.b32.xlu0 %v161_v21, %s1370_s25 }
 0x10a   :  { %817 = vrot.lane.b32.xlu1 %v157_v19, %s1371_s26  ;;  %819 = vrot.lane.b32.xlu0 %v157_v19, %s1372_s27 }
 0x10e   :  { %895 = vrot.lane.b32.xlu1 %v161_v21, %s1371_s26  ;;  %897 = vrot.lane.b32.xlu0 %v161_v21, %s1372_s27 }
 0x168   :  { %v386_v23 = vpop.permute.xlu1 %385  ;;  %v168_v24 = vpop.permute.xlu0 %167 }
 0x169   :  { %1216 = vmatpush3.xpose.msk.msra.mxu1 %vm169_vm1, %v168_v24 }
 0x16a   :  { %1220 = vmatprep.subr.mxu1 %v1364_v18 }
 0x16c   :  { %v384_v25 = vpop.permute.xlu1 %383  ;;  %1218 = vmatmul.mubr.msk.f32.vlgmr.msra.gmra.mrb[0].mxu1 %vm169_vm1, %v157_v19  ;;  %v246_v26 = vpop.permute.xlu0 %245 }
 0x16d   :  { %1221 = vmatpush3.xpose.msk.msra.mxu1 %vm169_vm1, %v246_v26  ;;  %1222 = vmatprep.mubr.msk.f32.mxu1 %vm1365_vm0, %v1364_v18 }
 0x16e   :  { %1225 = vmatprep.subr.mxu1 %v1364_v18 }
 0x170   :  { %v462_v27 = vpop.permute.xlu1 %461  ;;  %1223 = vmatmul.mubr.msk.f32.vlgmr.msra.gmra.mrb[2].mxu1 %vm169_vm1, %v161_v21  ;;  %v464_v28 = vpop.permute.xlu0 %463 }
 0x171   :  { %1226 = vmatpush3.xpose.msk.msra.mxu1 %vm169_vm1, %v386_v23  ;;  %1227 = vmatprep.mubr.msk.f32.mxu1 %vm1365_vm0, %v1364_v18 }
 0x172   :  { %1230 = vmatprep.subr.mxu1 %v1364_v18 }
 0x174   :  { %1228 = vmatmul.mubr.msk.f32.vlgmr.msra.gmra.mrb[4].mxu1 %vm169_vm1, %v384_v25  ;;  %v603_v29 = vpop.permute.xlu0 %602  ;;  %v601_v30 = vpop.permute.xlu1 %600 }
 0x175   :  { %1231 = vmatpush3.xpose.msk.msra.mxu1 %vm169_vm1, %v464_v28  ;;  %1232 = vmatprep.mubr.msk.f32.mxu1 %vm1365_vm0, %v1364_v18 }
 0x176   :  { %1235 = vmatprep.subr.mxu1 %v1364_v18 }
 0x178   :  { %1233 = vmatmul.mubr.msk.f32.vlgmr.msra.gmra.mrb[6].mxu1 %vm169_vm1, %v462_v27  ;;  %v681_v31 = vpop.permute.xlu0 %680  ;;  %v679_v32 = vpop.permute.xlu1 %678 }
 0x179   :  { %1236 = vmatpush3.xpose.msk.msra.mxu1 %vm169_vm1, %v603_v29  ;;  %1237 = vmatprep.mubr.msk.f32.mxu1 %vm1365_vm0, %v1364_v18 }
 0x17a   :  { %1240 = vmatprep.subr.mxu1 %v1364_v18 }
 0x17c   :  { %1238 = vmatmul.mubr.msk.f32.vlgmr.msra.gmra.mrb[8].mxu1 %vm169_vm1, %v601_v30  ;;  %v820_v33 = vpop.permute.xlu0 %819  ;;  %v818_v34 = vpop.permute.xlu1 %817 }
 0x17d   :  { %1241 = vmatpush3.xpose.msk.msra.mxu1 %vm169_vm1, %v681_v31  ;;  %1242 = vmatprep.mubr.msk.f32.mxu1 %vm1365_vm0, %v1364_v18 }
 0x17e   :  { %1245 = vmatprep.subr.mxu1 %v1364_v18 }
 0x180   :  { %1243 = vmatmul.mubr.msk.f32.vlgmr.msra.gmra.mrb[10].mxu1 %vm169_vm1, %v679_v32  ;;  %v898_v35 = vpop.permute.xlu0 %897  ;;  %v896_v36 = vpop.permute.xlu1 %895 }
 0x181   :  { %1246 = vmatpush3.xpose.msk.msra.mxu1 %vm169_vm1, %v820_v33  ;;  %1247 = vmatprep.mubr.msk.f32.mxu1 %vm1365_vm0, %v1364_v18 }
 0x182   :  { %1250 = vmatprep.subr.mxu1 %v1364_v18 }
 0x184   :  { %1248 = vmatmul.mubr.msk.f32.vlgmr.msra.gmra.mrb[12].mxu1 %vm169_vm1, %v818_v34 }
 0x185   :  { %1251 = vmatpush3.xpose.msk.msra.mxu1 %vm169_vm1, %v898_v35  ;;  %1252 = vmatprep.mubr.msk.f32.mxu1 %vm1365_vm0, %v1364_v18 }
 0x188   :  { %1253 = vmatmul.mubr.msk.f32.vlgmr.msra.gmra.mrb[14].mxu1 %vm169_vm1, %v896_v36 }
 0x23f   :  { %v240_v37 = vpop.f32.mrb[0].mxu1 }
 0x240   :  { %v1219_v38 = vpop.f32.mrb[1].mxu1  ;;  %v322_v39 = vsel %vm321_vm2, %v240_v37, -inf }
 0x241   :  { %323 = vmax.xlane.f32.xlu0 %v322_v39 }
 0x243   :  { %v317_v40 = vpop.f32.mrb[2].mxu1 }
 0x244   :  { %v1224_v41 = vpop.f32.mrb[3].mxu1  ;;  %v325_v42 = vsel %vm321_vm2, %v317_v40, -inf }
 0x245   :  { %326 = vmax.xlane.f32.xlu1 %v325_v42 }
 0x247   :  { %v457_v43 = vpop.f32.mrb[4].mxu1 }
 0x248   :  { %v1229_v44 = vpop.f32.mrb[5].mxu1  ;;  %v539_v45 = vsel %vm321_vm2, %v457_v43, -inf }
 0x249   :  { %540 = vmax.xlane.f32.xlu0 %v539_v45 }
 0x24b   :  { %v535_v46 = vpop.f32.mrb[6].mxu1 }
 0x24c   :  { %v1234_v47 = vpop.f32.mrb[7].mxu1  ;;  %v542_v48 = vsel %vm321_vm2, %v535_v46, -inf }
 0x24d   :  { %543 = vmax.xlane.f32.xlu0 %v542_v48 }
 0x24f   :  { %v674_v49 = vpop.f32.mrb[8].mxu1 }
 0x250   :  { %v1239_v50 = vpop.f32.mrb[9].mxu1  ;;  %v756_v51 = vsel %vm321_vm2, %v674_v49, -inf }
 0x251   :  { %757 = vmax.xlane.f32.xlu1 %v756_v51 }
 0x253   :  { %v752_v52 = vpop.f32.mrb[10].mxu1 }
 0x254   :  { %v1244_v53 = vpop.f32.mrb[11].mxu1  ;;  %v759_v54 = vsel %vm321_vm2, %v752_v52, -inf }
 0x255   :  { %760 = vmax.xlane.f32.xlu0 %v759_v54 }
 0x257   :  { %v891_v55 = vpop.f32.mrb[12].mxu1 }
 0x258   :  { %v1249_v56 = vpop.f32.mrb[13].mxu1  ;;  %v973_v57 = vsel %vm321_vm2, %v891_v55, -inf }
 0x259   :  { %974 = vmax.xlane.f32.xlu1 %v973_v57 }
 0x25b   :  { %v969_v58 = vpop.f32.mrb[14].mxu1 }
 0x25c   :  { %v1254_v59 = vpop.f32.mrb[15].mxu1  ;;  %v976_v60 = vsel %vm321_vm2, %v969_v58, -inf }
 0x25d   :  { %977 = vmax.xlane.f32.xlu0 %v976_v60 }
 0x2ce   :  { %v324_v61 = vpop.xlane.xlu0 %323 }
 0x2cf   :  { %v328_v62 = vsub.f32 %v240_v37, %v324_v61 }
 0x2d1   :  { %v330_v63 = vmul.f32 1.442695, %v328_v62 }
 0x2d2   :  { %v327_v0 = vpop.xlane.xlu1 %326 }
 0x2d3   :  { %1307 = vpow2.f32 %v330_v63  ;;  %v329_v1 = vsub.f32 %v317_v40, %v327_v0 }
 0x2d5   :  { %v332_v2 = vmul.f32 1.442695, %v329_v1 }
 0x2d6   :  { %v541_v3 = vpop.xlane.xlu0 %540 }
 0x2d7   :  { %1309 = vpow2.f32 %v332_v2  ;;  %v545_v4 = vsub.f32 %v457_v43, %v541_v3 }
 0x2d9   :  { %v547_v5 = vmul.f32 1.442695, %v545_v4 }
 0x2da   :  { %v544_v6 = vpop.xlane.xlu0 %543 }
 0x2db   :  { %1311 = vpow2.f32 %v547_v5  ;;  %v546_v7 = vsub.f32 %v535_v46, %v544_v6 }
 0x2dd   :  { %v1308_v8 = vpop.eup %1307  ;;  %v549_v9 = vmul.f32 1.442695, %v546_v7 }
 0x2de   :  { %v758_v10 = vpop.xlane.xlu1 %757  ;;  %v334_v11 = vsel %vm321_vm2, %v1308_v8, 0.0 }
 0x2df   :  { %1313 = vpow2.f32 %v549_v9  ;;  %v762_v12 = vsub.f32 %v674_v49, %v758_v10  ;;  %335 = vadd.xlane.f32.xlu1 %v334_v11 }
 0x2e1   :  { %v1310_v13 = vpop.eup %1309  ;;  %v764_v14 = vmul.f32 1.442695, %v762_v12 }
 0x2e2   :  { %v761_v15 = vpop.xlane.xlu0 %760  ;;  %v337_v16 = vsel %vm321_vm2, %v1310_v13, 0.0 }
 0x2e3   :  { %1315 = vpow2.f32 %v764_v14  ;;  %v763_v17 = vsub.f32 %v752_v52, %v761_v15  ;;  %338 = vadd.xlane.f32.xlu0 %v337_v16 }
 0x2e5   :  { %v1312_v19 = vpop.eup %1311  ;;  %v766_v21 = vmul.f32 1.442695, %v763_v17 }
 0x2e6   :  { %v975_v23 = vpop.xlane.xlu1 %974  ;;  %v551_v24 = vsel %vm321_vm2, %v1312_v19, 0.0 }
 0x2e7   :  { %1317 = vpow2.f32 %v766_v21  ;;  %v979_v25 = vsub.f32 %v891_v55, %v975_v23  ;;  %552 = vadd.xlane.f32.xlu1 %v551_v24 }
 0x2e9   :  { %v1314_v26 = vpop.eup %1313  ;;  %v981_v27 = vmul.f32 1.442695, %v979_v25 }
 0x2ea   :  { %v978_v28 = vpop.xlane.xlu0 %977  ;;  %v554_v29 = vsel %vm321_vm2, %v1314_v26, 0.0 }
 0x2eb   :  { %1319 = vpow2.f32 %v981_v27  ;;  %v980_v30 = vsub.f32 %v969_v58, %v978_v28  ;;  %555 = vadd.xlane.f32.xlu0 %v554_v29 }
 0x2ed   :  { %v1316_v31 = vpop.eup %1315  ;;  %v983_v32 = vmul.f32 1.442695, %v980_v30 }
 0x2ee   :  { %v768_v33 = vsel %vm321_vm2, %v1316_v31, 0.0 }
 0x2ef   :  { %1321 = vpow2.f32 %v983_v32  ;;  %769 = vadd.xlane.f32.xlu1 %v768_v33 }
 0x2f1   :  { %v1510_v34 = vpop.eup %1317 }
 0x2f2   :  { %v771_v35 = vsel %vm321_vm2, %v1510_v34, 0.0 }
 0x2f3   :  { %772 = vadd.xlane.f32.xlu0 %v771_v35 }
 0x2f5   :  { %v1514_v36 = vpop.eup %1319 }
 0x2f6   :  { %v985_v37 = vsel %vm321_vm2, %v1514_v36, 0.0 }
 0x2f7   :  { %986 = vadd.xlane.f32.xlu1 %v985_v37 }
 0x2f9   :  { %v1518_v38 = vpop.eup %1321 }
 0x2fa   :  { %v988_v39 = vsel %vm321_vm2, %v1518_v38, 0.0 }
 0x2fb   :  { %989 = vadd.xlane.f32.xlu0 %v988_v39 }
 0x36c   :  { %v336_v40 = vpop.xlane.xlu1 %335 }
 0x36d   :  { %1323 = vrcp.f32 %v336_v40 }
 0x370   :  { %v339_v41 = vpop.xlane.xlu0 %338 }
 0x371   :  { %1325 = vrcp.f32 %v339_v41 }
 0x374   :  { %v553_v42 = vpop.xlane.xlu1 %552 }
 0x375   :  { %1327 = vrcp.f32 %v553_v42 }
 0x377   :  { %v1324_v43 = vpop.eup %1323 }
 0x378   :  { %v556_v44 = vpop.xlane.xlu0 %555  ;;  %v342_v45 = vmul.f32 %v1324_v43, %v1308_v8 }
 0x379   :  { %1329 = vrcp.f32 %v556_v44 }
 0x37a   :  { %v344_v46 = vsel %vm321_vm2, %v342_v45, 0.0 }
 0x37b   :  { %v1326_v47 = vpop.eup %1325  ;;  %v345_v48 = vrot.slane %v344_v46, 4 }
 0x37c   :  { %v770_v49 = vpop.xlane.xlu1 %769  ;;  %v343_v50 = vmul.f32 %v1326_v47, %v1310_v13 }
 0x37d   :  { %1331 = vrcp.f32 %v770_v49  ;;  %v346_v51 = vadd.f32 %v345_v48, %v344_v46 }
 0x37e   :  { %v351_v52 = vsel %vm321_vm2, %v343_v50, 0.0 }
 0x37f   :  { %v1328_v53 = vpop.eup %1327  ;;  %v347_v54 = vrot.slane %v346_v51, 2  ;;  %v352_v55 = vrot.slane %v351_v52, 4 }
 0x380   :  { %v773_v56 = vpop.xlane.xlu0 %772  ;;  %v559_v57 = vmul.f32 %v1328_v53, %v1312_v19 }
 0x381   :  { %1333 = vrcp.f32 %v773_v56  ;;  %v348_v58 = vadd.f32 %v347_v54, %v346_v51  ;;  %v353_v59 = vadd.f32 %v352_v55, %v351_v52 }
 0x382   :  { %v561_v60 = vsel %vm321_vm2, %v559_v57, 0.0 }
 0x383   :  { %v1330_v61 = vpop.eup %1329  ;;  %v349_v62 = vrot.slane %v348_v58, 1  ;;  %v354_v63 = vrot.slane %v353_v59, 2  ;;  %v562_v0 = vrot.slane %v561_v60, 4 }
 0x384   :  { %v987_v1 = vpop.xlane.xlu1 %986  ;;  %v560_v2 = vmul.f32 %v1330_v61, %v1314_v26 }
 0x385   :  { %1335 = vrcp.f32 %v987_v1  ;;  %v350_v3 = vadd.f32 %v349_v62, %v348_v58  ;;  %v355_v4 = vadd.f32 %v354_v63, %v353_v59  ;;  %v563_v5 = vadd.f32 %v562_v0, %v561_v60  ;;  %v1303_v59 = vld [vmem:[%s1584_s2] sm:$0xff]   ;;  %v1304_v0 = vld [vmem:[%s1584_s2 + $0x8] sm:$0xff]  }
 0x386   :  { %v568_v6 = vsel %vm321_vm2, %v560_v2, 0.0  ;;  %1256 = vmatpush3.bf16.msra.mxu0 %v1303_v59 }
 0x387   :  { %v1332_v7 = vpop.eup %1331  ;;  %v359_v8 = vmul.f32 0.125, %v350_v3  ;;  %v356_v9 = vrot.slane %v355_v4, 1  ;;  %v564_v10 = vrot.slane %v563_v5, 2  ;;  %v569_v11 = vrot.slane %v568_v6, 4  ;;  %1257 = vmatprep.subr.bf16.mxu0 %v1364_v18 }
 0x388   :  { %v990_v12 = vpop.xlane.xlu0 %989  ;;  %v776_v13 = vmul.f32 %v1332_v7, %v1316_v31 }
 0x389   :  { %1337 = vrcp.f32 %v990_v12  ;;  %362 = vbcast.lane.b32.xlu1 %v359_v8, 256  ;;  %v357_v14 = vadd.f32 %v356_v9, %v355_v4  ;;  %v565_v15 = vadd.f32 %v564_v10, %v563_v5  ;;  %v570_v16 = vadd.f32 %v569_v11, %v568_v6  ;;  %v1305_v4 = vld [vmem:[%s1584_s2 + $0x10] sm:$0xff]   ;;  %v1306_v6 = vld [vmem:[%s1584_s2 + $0x18] sm:$0xff]  }
 0x38a   :  { %v778_v17 = vsel %vm321_vm2, %v776_v13, 0.0  ;;  %1258 = vmatpush3.bf16.msra.mxu0 %v1304_v0 }
 0x38b   :  { %v1334_v19 = vpop.eup %1333  ;;  %v360_v21 = vmul.f32 0.125, %v357_v14  ;;  %v566_v23 = vrot.slane %v565_v15, 1  ;;  %v571_v24 = vrot.slane %v570_v16, 2  ;;  %v779_v25 = vrot.slane %v778_v17, 4  ;;  %1259 = vmatprep.subr.bf16.mxu0 %v1364_v18 }
 0x38c   :  { %v777_v26 = vmul.f32 %v1334_v19, %v1510_v34 }
 0x38d   :  { %365 = vbcast.lane.b32.xlu0 %v360_v21, 256  ;;  %v567_v27 = vadd.f32 %v566_v23, %v565_v15  ;;  %v572_v28 = vadd.f32 %v571_v24, %v570_v16  ;;  %v780_v29 = vadd.f32 %v779_v25, %v778_v17 }
 0x38e   :  { %v785_v30 = vsel %vm321_vm2, %v777_v26, 0.0  ;;  %1260 = vmatpush3.bf16.msra.mxu0 %v1305_v4 }
 0x38f   :  { %v1336_v31 = vpop.eup %1335  ;;  %v575_v32 = vmul.f32 0.125, %v567_v27  ;;  %v573_v33 = vrot.slane %v572_v28, 1  ;;  %v781_v35 = vrot.slane %v780_v29, 2  ;;  %v786_v37 = vrot.slane %v785_v30, 4  ;;  %1261 = vmatprep.subr.bf16.mxu0 %v1364_v18 }
 0x390   :  { %v993_v39 = vmul.f32 %v1336_v31, %v1514_v36 }
 0x391   :  { %578 = vbcast.lane.b32.xlu1 %v575_v32, 256  ;;  %v574_v40 = vadd.f32 %v573_v33, %v572_v28  ;;  %v782_v41 = vadd.f32 %v781_v35, %v780_v29  ;;  %v787_v42 = vadd.f32 %v786_v37, %v785_v30 }
 0x392   :  { %v995_v43 = vsel %vm321_vm2, %v993_v39, 0.0  ;;  %1262 = vmatpush3.bf16.msra.mxu0 %v1306_v6 }
 0x393   :  { %v1338_v34 = vpop.eup %1337  ;;  %v576_v44 = vmul.f32 0.125, %v574_v40  ;;  %v783_v45 = vrot.slane %v782_v41, 1  ;;  %v788_v46 = vrot.slane %v787_v42, 2  ;;  %v996_v47 = vrot.slane %v995_v43, 4 }
 0x394   :  { %v994_v48 = vmul.f32 %v1338_v34, %v1518_v38 }
 0x395   :  { %581 = vbcast.lane.b32.xlu1 %v576_v44, 256  ;;  %v784_v49 = vadd.f32 %v783_v45, %v782_v41  ;;  %v789_v50 = vadd.f32 %v788_v46, %v787_v42  ;;  %v997_v51 = vadd.f32 %v996_v47, %v995_v43 }
 0x396   :  { %v1002_v52 = vsel %vm321_vm2, %v994_v48, 0.0 }
 0x397   :  { %v792_v36 = vmul.f32 0.125, %v784_v49  ;;  %v790_v53 = vrot.slane %v789_v50, 1  ;;  %v998_v54 = vrot.slane %v997_v51, 2  ;;  %v1003_v55 = vrot.slane %v1002_v52, 4 }
 0x399   :  { %795 = vbcast.lane.b32.xlu0 %v792_v36, 256  ;;  %v791_v56 = vadd.f32 %v790_v53, %v789_v50  ;;  %v999_v57 = vadd.f32 %v998_v54, %v997_v51  ;;  %v1004_v58 = vadd.f32 %v1003_v55, %v1002_v52 }
 0x39b   :  { %v793_v60 = vmul.f32 0.125, %v791_v56  ;;  %v1000_v38 = vrot.slane %v999_v57, 1  ;;  %v1005_v61 = vrot.slane %v1004_v58, 2 }
 0x39d   :  { %798 = vbcast.lane.b32.xlu1 %v793_v60, 256  ;;  %v1001_v62 = vadd.f32 %v1000_v38, %v999_v57  ;;  %v1006_v63 = vadd.f32 %v1005_v61, %v1004_v58 }
 0x39f   :  { %v1009_v1 = vmul.f32 0.125, %v1001_v62  ;;  %v1007_v2 = vrot.slane %v1006_v63, 1 }
 0x3a1   :  { %1012 = vbcast.lane.b32.xlu0 %v1009_v1, 256  ;;  %v1008_v3 = vadd.f32 %v1007_v2, %v1006_v63 }
 0x3a3   :  { %v1010_v5 = vmul.f32 0.125, %v1008_v3 }
 0x3a5   :  { %1015 = vbcast.lane.b32.xlu1 %v1010_v5, 256 }
 0x3fb   :  { %v363_v7 = vpop.permute.xlu1 %362 }
 0x3fc   :  { %v367_v8 = vmul.f32 %v363_v7, %v1456_v20 }
 0x3fe   :  { %v369_v9 = vsel %vm169_vm1, %v367_v8, 0.0 }
 0x3ff   :  { %v370_v10 = vrot.slane %v369_v9, 4  ;;  %v366_v11 = vpop.permute.xlu0 %365 }
 0x400   :  { %v368_v12 = vmul.f32 %v366_v11, %v1458_v22 }
 0x401   :  { %v371_v13 = vadd.f32 %v370_v10, %v369_v9 }
 0x402   :  { %v376_v14 = vsel %vm169_vm1, %v368_v12, 0.0 }
 0x403   :  { %v372_v15 = vrot.slane %v371_v13, 2  ;;  %v377_v16 = vrot.slane %v376_v14, 4  ;;  %v579_v18 = vpop.permute.xlu1 %578 }
 0x404   :  { %v583_v17 = vmul.f32 %v579_v18, %v1456_v20 }
 0x405   :  { %v373_v19 = vadd.f32 %v372_v15, %v371_v13  ;;  %v378_v21 = vadd.f32 %v377_v16, %v376_v14 }
 0x406   :  { %v586_v23 = vsel %vm585_vm3, %v583_v17, 0.0 }
 0x407   :  { %v379_v24 = vrot.slane %v378_v21, 2  ;;  %v587_v25 = vrot.slane %v586_v23, 4  ;;  %v582_v26 = vpop.permute.xlu1 %581  ;;  %v374_v28 = vrot.slane %v373_v19, 1 }
 0x408   :  { %v584_v27 = vmul.f32 %v582_v26, %v1458_v22 }
 0x409   :  { %v380_v29 = vadd.f32 %v379_v24, %v378_v21  ;;  %v588_v30 = vadd.f32 %v587_v25, %v586_v23  ;;  %v375_v40 = vadd.f32 %v374_v28, %v373_v19  ;;  %v1188_v25 = vld [vmem:[%s1585_s3] ss:$0 sm:$0xff] }
 0x40a   :  { %v593_v31 = vsel %vm585_vm3, %v584_v27, 0.0 }
 0x40b   :  { %v381_v32 = vrot.slane %v380_v29, 1  ;;  %v589_v33 = vrot.slane %v588_v30, 2  ;;  %v594_v35 = vrot.slane %v593_v31, 4  ;;  %v796_v37 = vpop.permute.xlu0 %795 }
 0x40c   :  { %v800_v39 = vmul.f32 %v796_v37, %v1456_v20 }
 0x40d   :  { %v382_v41 = vadd.f32 %v381_v32, %v380_v29  ;;  %v590_v42 = vadd.f32 %v589_v33, %v588_v30  ;;  %v595_v43 = vadd.f32 %v594_v35, %v593_v31 }
 0x40e   :  { %v803_v34 = vsel %vm802_vm4, %v800_v39, 0.0 }
 0x40f   :  { %v1037_v44 = vsel %vm1036_vm5, %v382_v41, %v375_v40  ;;  %v596_v45 = vrot.slane %v595_v43, 2  ;;  %v804_v46 = vrot.slane %v803_v34, 4  ;;  %v799_v47 = vpop.permute.xlu1 %798  ;;  %v591_v49 = vrot.slane %v590_v42, 1 }
 0x410   :  { %v801_v48 = vmul.f32 %v799_v47, %v1458_v22 }
 0x411   :  { %v597_v50 = vadd.f32 %v596_v45, %v595_v43  ;;  %v805_v51 = vadd.f32 %v804_v46, %v803_v34  ;;  %v592_v57 = vadd.f32 %v591_v49, %v590_v42 }
 0x412   :  { %v810_v52 = vsel %vm802_vm4, %v801_v48, 0.0 }
 0x413   :  { %v598_v36 = vrot.slane %v597_v50, 1  ;;  %v806_v53 = vrot.slane %v805_v51, 2  ;;  %v811_v54 = vrot.slane %v810_v52, 4  ;;  %v1013_v55 = vpop.permute.xlu0 %1012 }
 0x414   :  { %v1017_v56 = vmul.f32 %v1013_v55, %v1456_v20 }
 0x415   :  { %v599_v58 = vadd.f32 %v598_v36, %v597_v50  ;;  %v807_v59 = vadd.f32 %v806_v53, %v805_v51  ;;  %v812_v60 = vadd.f32 %v811_v54, %v810_v52 }
 0x416   :  { %v1020_v38 = vsel %vm1019_vm6, %v1017_v56, 0.0 }
 0x417   :  { %v1041_v61 = vsel %vm1036_vm5, %v599_v58, %v592_v57  ;;  %v813_v62 = vrot.slane %v812_v60, 2  ;;  %v1021_v63 = vrot.slane %v1020_v38, 4  ;;  %v1016_v0 = vpop.permute.xlu1 %1015  ;;  %v808_v3 = vrot.slane %v807_v59, 1 }
 0x418   :  { %v1051_v1 = vsel %vm169_vm1, %v1037_v44, %v1041_v61  ;;  %v1018_v2 = vmul.f32 %v1016_v0, %v1458_v22 }
 0x419   :  { %v814_v4 = vadd.f32 %v813_v62, %v812_v60  ;;  %v1022_v5 = vadd.f32 %v1021_v63, %v1020_v38  ;;  %v809_v9 = vadd.f32 %v808_v3, %v807_v59 }
 0x41a   :  { %v1027_v20 = vsel %vm1019_vm6, %v1018_v2, 0.0 }
 0x41b   :  { %v815_v6 = vrot.slane %v814_v4, 1  ;;  %v1023_v7 = vrot.slane %v1022_v5, 2  ;;  %v1028_v8 = vrot.slane %v1027_v20, 4 }
 0x41d   :  { %v816_v10 = vadd.f32 %v815_v6, %v814_v4  ;;  %v1024_v11 = vadd.f32 %v1023_v7, %v1022_v5  ;;  %v1029_v12 = vadd.f32 %v1028_v8, %v1027_v20 }
 0x41f   :  { %v1045_v13 = vsel %vm1036_vm5, %v816_v10, %v809_v9  ;;  %v1030_v14 = vrot.slane %v1029_v12, 2  ;;  %v1025_v16 = vrot.slane %v1024_v11, 1 }
 0x420   :  { %v1053_v15 = vsel %vm1052_vm7, %v1051_v1, %v1045_v13 }
 0x421   :  { %v1031_v18 = vadd.f32 %v1030_v14, %v1029_v12  ;;  %v1026_v17 = vadd.f32 %v1025_v16, %v1024_v11 }
 0x423   :  { %v1032_v22 = vrot.slane %v1031_v18, 1 }
 0x425   :  { %v1033_v19 = vadd.f32 %v1032_v22, %v1031_v18 }
 0x427   :  { %v1049_v21 = vsel %vm1036_vm5, %v1033_v19, %v1026_v17 }
 0x428   :  { %v1055_v23 = vsel %vm1054_vm8, %v1053_v15, %v1049_v21 }
 0x429   :  { %v1056_v24 = vpack.c.bf16 %v1055_v23, %v1055_v23 }
 0x42b   :  { %1264 = vmatmul.mubr.msk.bf16.vlgmr.msra.gmra.mrb[4].mxu0 %vm1096_vm9, %v1056_v24 }
 0x4fe   :  { %v1134_v26 = vpop.f32.mrb[4].mxu0 }
 0x4ff   :  { %v1135_v27 = vadd.f32 %v1188_v25, %v1134_v26  ;;  %v1265_v28 = vpop.f32.mrb[5].mxu0 }
 0x500   :  { %v1137_v29 = vpop.f32.mrb[6].mxu0 }
 0x501   :  { %1140 = vst [vmem:[#allocation2] sm:$0x3] %v1135_v27  ;;  %v1266_v30 = vpop.f32.mrb[7].mxu0 }
 0x502   :  { %1350 = shalt.err (!%p1347_p4)
}
 0x503   :  { %s1351_s3 = scalar_lea.hbm %s1586_s4, 32 }
 0x504   :  { %p1352_p5 = scmp.ne.s32.totalorder %s1586_s4, %s1351_s3  ;;  %p1355_p6 = scmp.lt.u32.totalorder %s1351_s3, %s1586_s4 }
 0x506   :  { %p1357_p7 = pnand %p1355_p6, %p1352_p5 }
 0x508   :  { %1360 = shalt.err (!%p1357_p7)
}
 0x509   :  { %1150 = dma.vmem_to_hbm [thread:$0]  %s1148_s12, 32, %s1586_s4, [#allocation3]  }
 0x50a   :  { %1361 = dma.done.wait [#allocation3], 32  }
 0x50b   :  { %1362 = vsyncadd [#allocation3], 4294967264 }
 0x50c   :  { %1154 = vsyncpa [#allocation3], 1 }

</bundles_post_ra>
